<compile_context>
chip_gen: v6e
topology: v6e:2x2x1
jax: 0.10.0
libtpu: 0.0.40
codegen_flags: <defaults>
</compile_context>

<pallas_src>
import functools

import jax
import jax.numpy as jnp
from jax.experimental import pallas as pl
from jax.experimental.pallas import tpu as pltpu


def _residual_ffn_kernel(x_ref, w1_ref, b1_ref, w2_ref, b2_ref, o_ref):
    x = x_ref[...]                                   # (tile_m, H)
    x_f32 = x.astype(jnp.float32)

    # linear1 + ReLU (f32 accumulation on the MXU)
    h = jnp.dot(x, w1_ref[...], preferred_element_type=jnp.float32)
    h = h + b1_ref[...]                              # (1, H) broadcasts over rows
    h = jnp.maximum(h, 0.0)

    # TODO(synk): nn.Dropout is identity in eval mode; training-mode dropout
    # would use pltpu.prng_seed + pltpu.stateful_bernoulli here.

    # linear2 + bias + residual
    y = jnp.dot(h.astype(w2_ref.dtype), w2_ref[...],
                preferred_element_type=jnp.float32)
    y = y + b2_ref[...] + x_f32

    o_ref[...] = y.astype(o_ref.dtype)


def residual_feed_forward(x, w1, b1, w2, b2, *, tile_m=None):
    """Pallas implementation of ResidualFeedForward.forward (eval mode).

    x : (..., hidden)            input
    w1: (hidden, hidden)         linear1 weight, laid out for `x @ w1`
                                 (i.e. PyTorch weight transposed)
    b1: (hidden,)                linear1 bias
    w2: (hidden, hidden)         linear2 weight, laid out for `h @ w2`
    b2: (hidden,)                linear2 bias
    """
    orig_shape = x.shape
    hidden = orig_shape[-1]
    x2 = x.reshape(-1, hidden)
    m = x2.shape[0]

    b1_2 = b1.reshape(1, hidden).astype(jnp.float32)
    b2_2 = b2.reshape(1, hidden).astype(jnp.float32)

    # Row tile: multiple of 8 sublanes, capped so (in + out) double buffers
    # stay small (a 512 x hidden f32 tile is ~64 KiB per buffer at hidden=32,
    # comfortably inside the scoped-VMEM default on every chip generation).
    if tile_m is None:
        tile_m = 512
    tile_m = max(8, ((min(tile_m, max(m, 1)) + 7) // 8) * 8)

    grid_m = pl.cdiv(m, tile_m)
    m_padded = grid_m * tile_m
    if m_padded != m:
        x2 = jnp.pad(x2, ((0, m_padded - m), (0, 0)))

    out = pl.pallas_call(
        _residual_ffn_kernel,
        out_shape=jax.ShapeDtypeStruct((m_padded, hidden), x.dtype),
        grid=(grid_m,),
        in_specs=[
            pl.BlockSpec((tile_m, hidden), lambda i: (i, 0)),       # x tile
            pl.BlockSpec((hidden, hidden), lambda i: (0, 0)),       # w1 (resident)
            pl.BlockSpec((1, hidden), lambda i: (0, 0)),            # b1 (resident)
            pl.BlockSpec((hidden, hidden), lambda i: (0, 0)),       # w2 (resident)
            pl.BlockSpec((1, hidden), lambda i: (0, 0)),            # b2 (resident)
        ],
        out_specs=pl.BlockSpec((tile_m, hidden), lambda i: (i, 0)),
        compiler_params=pltpu.CompilerParams(
            dimension_semantics=("parallel",),
        ),
    )(x2, w1, b1_2, w2, b2_2)

    return out[:m].reshape(orig_shape)


if __name__ == "__main__":
    key = jax.random.PRNGKey(0)
    k1, k2, k3, k4, k5 = jax.random.split(key, 5)

    BATCH, SEQ, HIDDEN = 2, 8, 32

    x = jax.random.normal(k1, (BATCH, SEQ, HIDDEN), dtype=jnp.float32)

    # Deterministic synthetic parameters (PyTorch-style init scale).
    bound = 1.0 / jnp.sqrt(HIDDEN)
    w1 = jax.random.uniform(k2, (HIDDEN, HIDDEN), jnp.float32, -bound, bound)
    b1 = jax.random.uniform(k3, (HIDDEN,), jnp.float32, -bound, bound)
    w2 = jax.random.uniform(k4, (HIDDEN, HIDDEN), jnp.float32, -bound, bound)
    b2 = jax.random.uniform(k5, (HIDDEN,), jnp.float32, -bound, bound)

    out = residual_feed_forward(x, w1, b1, w2, b2)
    out = jax.block_until_ready(out)

    # Pure-JAX reference (same semantics as the PyTorch forward in eval mode).
    x2 = x.reshape(-1, HIDDEN)
    h_ref = jnp.maximum(x2 @ w1 + b1, 0.0)
    ref = (h_ref @ w2 + b2 + x2).reshape(x.shape)

    assert jnp.allclose(out, ref, atol=1e-5, rtol=1e-5), "mismatch vs reference"

    print("KERNEL_OK")
</pallas_src>

<mosaic_0001>
module attributes {stable_mosaic.version = 11 : i64} {
  func.func @_residual_ffn_kernel(%arg0: i32, %arg1: memref<16x32xf32, #tpu.memory_space<vmem>>, %arg2: memref<32x32xf32, #tpu.memory_space<vmem>>, %arg3: memref<1x32xf32, #tpu.memory_space<vmem>>, %arg4: memref<32x32xf32, #tpu.memory_space<vmem>>, %arg5: memref<1x32xf32, #tpu.memory_space<vmem>>, %arg6: memref<16x32xf32, #tpu.memory_space<vmem>>) attributes {dimension_semantics = [#tpu.dimension_semantics<parallel>], iteration_bounds = array<i64: 1>, scalar_prefetch = 0 : i64, scratch_operands = 0 : i64, tpu.core_type = #tpu.core_type<tc>, window_params = [{transform_indices = @transform_0, window_bounds = array<i64: 16, 32>}, {pipeline_mode = #tpu.pipeline_mode<synchronous>, transform_indices = @transform_1, window_bounds = array<i64: 32, 32>}, {pipeline_mode = #tpu.pipeline_mode<synchronous>, transform_indices = @transform_2, window_bounds = array<i64: 1, 32>}, {pipeline_mode = #tpu.pipeline_mode<synchronous>, transform_indices = @transform_3, window_bounds = array<i64: 32, 32>}, {pipeline_mode = #tpu.pipeline_mode<synchronous>, transform_indices = @transform_4, window_bounds = array<i64: 1, 32>}, {transform_indices = @transform_5, window_bounds = array<i64: 16, 32>}]} {
    %c0 = arith.constant 0 : index
    %c0_0 = arith.constant 0 : index
    %0 = vector.load %arg1[%c0, %c0_0] : memref<16x32xf32, #tpu.memory_space<vmem>>, vector<16x32xf32>
    %c0_1 = arith.constant 0 : index
    %c0_2 = arith.constant 0 : index
    %1 = vector.load %arg2[%c0_1, %c0_2] : memref<32x32xf32, #tpu.memory_space<vmem>>, vector<32x32xf32>
    %cst = arith.constant dense<0.000000e+00> : vector<16x32xf32>
    %2 = tpu.matmul %0, %1, %cst {dimension_numbers = #tpu.dot_dimension_numbers<[1], [0], [0], [1], [0, 0, 1, 1], [], []>} : vector<16x32xf32>, vector<32x32xf32>, vector<16x32xf32> -> vector<16x32xf32>
    %c0_3 = arith.constant 0 : index
    %c0_4 = arith.constant 0 : index
    %3 = vector.load %arg3[%c0_3, %c0_4] : memref<1x32xf32, #tpu.memory_space<vmem>>, vector<1x32xf32>
    %4 = vector.broadcast %3 : vector<1x32xf32> to vector<16x32xf32>
    %5 = arith.addf %2, %4 : vector<16x32xf32>
    %cst_5 = arith.constant 0.000000e+00 : f32
    %6 = vector.broadcast %cst_5 : f32 to vector<16x32xf32>
    %7 = arith.maximumf %5, %6 : vector<16x32xf32>
    %c0_6 = arith.constant 0 : index
    %c0_7 = arith.constant 0 : index
    %8 = vector.load %arg4[%c0_6, %c0_7] : memref<32x32xf32, #tpu.memory_space<vmem>>, vector<32x32xf32>
    %cst_8 = arith.constant dense<0.000000e+00> : vector<16x32xf32>
    %9 = tpu.matmul %7, %8, %cst_8 {dimension_numbers = #tpu.dot_dimension_numbers<[1], [0], [0], [1], [0, 0, 1, 1], [], []>} : vector<16x32xf32>, vector<32x32xf32>, vector<16x32xf32> -> vector<16x32xf32>
    %c0_9 = arith.constant 0 : index
    %c0_10 = arith.constant 0 : index
    %10 = vector.load %arg5[%c0_9, %c0_10] : memref<1x32xf32, #tpu.memory_space<vmem>>, vector<1x32xf32>
    %11 = vector.broadcast %10 : vector<1x32xf32> to vector<16x32xf32>
    %12 = arith.addf %9, %11 : vector<16x32xf32>
    %13 = arith.addf %12, %0 : vector<16x32xf32>
    %c0_11 = arith.constant 0 : index
    %c0_12 = arith.constant 0 : index
    %14 = vector.load %arg6[%c0_11, %c0_12] : memref<16x32xf32, #tpu.memory_space<vmem>>, vector<16x32xf32>
    tpu.vector_store %arg6[%c0_11, %c0_12], %13 {strides = array<i32>} : memref<16x32xf32, #tpu.memory_space<vmem>>, vector<16x32xf32>,
    return
  }
  func.func @transform_0(%arg0: i32) -> (i32, i32) {
    %c0_i32 = arith.constant 0 : i32
    %c0_i32_0 = arith.constant 0 : i32
    return %arg0, %c0_i32 : i32, i32
  }
  func.func @transform_1(%arg0: i32) -> (i32, i32) {
    %c0_i32 = arith.constant 0 : i32
    %c0_i32_0 = arith.constant 0 : i32
    %c0_i32_1 = arith.constant 0 : i32
    return %c0_i32, %c0_i32_0 : i32, i32
  }
  func.func @transform_2(%arg0: i32) -> (i32, i32) {
    %c0_i32 = arith.constant 0 : i32
    %c0_i32_0 = arith.constant 0 : i32
    %c0_i32_1 = arith.constant 0 : i32
    return %c0_i32, %c0_i32_0 : i32, i32
  }
  func.func @transform_3(%arg0: i32) -> (i32, i32) {
    %c0_i32 = arith.constant 0 : i32
    %c0_i32_0 = arith.constant 0 : i32
    %c0_i32_1 = arith.constant 0 : i32
    return %c0_i32, %c0_i32_0 : i32, i32
  }
  func.func @transform_4(%arg0: i32) -> (i32, i32) {
    %c0_i32 = arith.constant 0 : i32
    %c0_i32_0 = arith.constant 0 : i32
    %c0_i32_1 = arith.constant 0 : i32
    return %c0_i32, %c0_i32_0 : i32, i32
  }
  func.func @transform_5(%arg0: i32) -> (i32, i32) {
    %c0_i32 = arith.constant 0 : i32
    %c0_i32_0 = arith.constant 0 : i32
    return %arg0, %c0_i32 : i32, i32
  }
}

</mosaic_0001>

<bundles_post_ra>
// kernel: tpu_custom_call.1
= control target key start
LH: loop header
LB: loop body
LE: loop exit
PB: predicated region body
PF: predicated region fallthrough
CT: control target
= control target key end

     0   :  { %10 = vsyncpa [#allocation3], 0  ;;  %s477_s0 = inlined_call_operand.hbm [shape: f32[16,32], index: 0, kind: input, shape index: {}]   ;;  %s478_s1 = inlined_call_operand.hbm [shape: f32[32,32], index: 1, kind: input, shape index: {}]   ;;  %s479_s2 = inlined_call_operand.vmem [shape: f32[1,32], index: 2, kind: input, shape index: {}]   ;;  %s480_s3 = inlined_call_operand.hbm [shape: f32[32,32], index: 3, kind: input, shape index: {}]   ;;  %s481_s4 = inlined_call_operand.vmem [shape: f32[1,32], index: 4, kind: input, shape index: {}]   ;;  %s482_s5 = inlined_call_operand.hbm [shape: f32[16,32], index: 5, kind: output, shape index: {}]  }
   0x1   :  { %11 = vsyncpa [#allocation6], 0 }
   0x2   :  { %12 = vsyncpa [#allocation4], 0  ;;  %s405_s18 = smov [#allocation5]   ;;  %s406_s20 = smov [#allocation2]  }
   0x3   :  { %s30_s19 = sshll.u32 %s405_s18, 4  ;;  %s18_s21 = sshll.u32 %s406_s20, 4  ;;  %s31_s19 = int_to_ptr.vmem [resolvable:$true] %s30_s19  ;;  %s19_s21 = int_to_ptr.vmem [resolvable:$true] %s18_s21 }
   0x4   :  { %s327_s22 = scalar_lea.vmem %s31_s19, 512  ;;  %p332_p1 = scmp.lt.s32.totalorder %s31_s19, %s31_s19 }
   0x5   :  { %p328_p0 = scmp.ne.s32.totalorder %s31_s19, %s327_s22  ;;  %p333_p2 = scmp.lt.s32.totalorder %s327_s22, %s327_s22 }
   0x7   :  { %p334_p3 = por %p333_p2, %p332_p1 }
   0x9   :  { %p335_p4 = pnand %p334_p3, %p328_p0 }
   0xb   :  { %338 = shalt.err (!%p335_p4)
}
   0xc   :  { %s407_s23 = smov 128   ;;  %s408_s24 = smov 8  }
   0xd   :  { %36 = dma.hbm_to_vmem [thread:$0]  %s478_s1, 512, %s31_s19, [#allocation6], %s407_s23, %s407_s23, %s408_s24  }
   0xe   :  { %s347_s27 = scalar_lea.vmem %s19_s21, 256  ;;  %p352_p6 = scmp.lt.s32.totalorder %s19_s21, %s19_s21 }
   0xf   :  { %p348_p5 = scmp.ne.s32.totalorder %s19_s21, %s347_s27  ;;  %p353_p7 = scmp.lt.s32.totalorder %s347_s27, %s347_s27 }
  0x11   :  { %p354_p8 = por %p353_p7, %p352_p6 }
  0x13   :  { %p355_p9 = pnand %p354_p8, %p348_p5 }
  0x15   :  { %358 = shalt.err (!%p355_p9)
}
  0x16   :  { %24 = dma.hbm_to_vmem [thread:$0]  %s477_s0, 256, %s19_s21, [#allocation3], %s407_s23, %s407_s23, %s408_s24  }
  0x17   :  { %s409_s30 = smov [#allocation7]  }
  0x18   :  { %s44_s6 = sshll.u32 %s409_s30, 4  ;;  %s45_s6 = int_to_ptr.vmem [resolvable:$true] %s44_s6 }
  0x19   :  { %s367_s7 = scalar_lea.vmem %s45_s6, 512  ;;  %p372_p11 = scmp.lt.s32.totalorder %s45_s6, %s45_s6 }
  0x1a   :  { %p368_p10 = scmp.ne.s32.totalorder %s45_s6, %s367_s7  ;;  %p373_p12 = scmp.lt.s32.totalorder %s367_s7, %s367_s7 }
  0x1c   :  { %p374_p13 = por %p373_p12, %p372_p11 }
  0x1e   :  { %p375_p0 = pnand %p374_p13, %p368_p10 }
  0x20   :  { %378 = shalt.err (!%p375_p0)
}
  0x21   :  { %50 = dma.hbm_to_vmem [thread:$0]  %s480_s3, 512, %s45_s6, [#allocation6], %s407_s23, %s407_s23, %s408_s24  }
  0x22   :  { %399 = dma.done.wait [#allocation3], 256  }
  0x23   :  { %400 = vsyncadd [#allocation3], 4294967040 }
  0x24   :  { %401 = dma.done.wait [#allocation6], 1024  }
  0x25   :  { %402 = vsyncadd [#allocation6], 4294966272  ;;  %vm75_vm0 = vcmask 261120   ;;  %v67_v0 = vld [vmem:[#allocation5 + $0x18] sm:$0xff]  ;;  %v66_v1 = vld [vmem:[#allocation5 + $0x10] sm:$0xff]  ;;  %s410_s11 = smov [#allocation8]  }
  0x26   :  { %291 = vmatprep.subr.mxu0 %v67_v0  ;;  %v62_v2 = vld [vmem:[#allocation2] sm:$0xff]  ;;  %v65_v3 = vld [vmem:[#allocation5 + $0x8] sm:$0xff]  ;;  %v64_v4 = vld [vmem:[#allocation5] sm:$0xff]  ;;  %s260_s12 = sshll.u32 %s410_s11, 4  ;;  %s261_s12 = int_to_ptr.vmem [resolvable:$true] %s260_s12 }
  0x27   :  { %292 = vmatpush3.msra.mxu0 %v67_v0  ;;  %299 = vmatprep.mubr.msk.f32.mxu0 %vm75_vm0, %v62_v2  ;;  %v63_v5 = vld [vmem:[#allocation2 + $0x8] sm:$0xff]  ;;  %v161_v7 = vld [vmem:[#allocation7 + $0x10] sm:$0xff]  ;;  %v160_v8 = vld [vmem:[#allocation7 + $0x8] sm:$0xff]  ;;  %p384_p2 = scmp.lt.s32.totalorder %s261_s12, %s261_s12 }
  0x28   :  { %293 = vmatprep.subr.mxu0 %v66_v1  ;;  %v162_v6 = vld [vmem:[#allocation7 + $0x18] sm:$0xff]  ;;  %v159_v9 = vld [vmem:[#allocation7] sm:$0xff]  ;;  %v273_v10 = vld [vmem:[%s479_s2] ss:$0 sm:$0xff]  ;;  %s379_s2 = scalar_lea.vmem %s261_s12, 256 }
  0x29   :  { %294 = vmatpush3.msra.mxu0 %v66_v1  ;;  %302 = vmatprep.subr.mxu1 %v162_v6  ;;  %v276_v17 = vld [vmem:[%s481_s4] ss:$0 sm:$0xff]  ;;  %p380_p1 = scmp.ne.s32.totalorder %s261_s12, %s379_s2  ;;  %p385_p3 = scmp.lt.s32.totalorder %s379_s2, %s379_s2 }
  0x2a   :  { %295 = vmatprep.subr.mxu0 %v65_v3  ;;  %303 = vmatpush3.msra.mxu1 %v162_v6 }
  0x2b   :  { %296 = vmatpush3.msra.mxu0 %v65_v3  ;;  %304 = vmatprep.subr.mxu1 %v161_v7  ;;  %p386_p4 = por %p385_p3, %p384_p2 }
  0x2c   :  { %297 = vmatprep.subr.mxu0 %v64_v4  ;;  %305 = vmatpush3.msra.mxu1 %v161_v7 }
  0x2d   :  { %298 = vmatpush3.msra.mxu0 %v64_v4  ;;  %306 = vmatprep.subr.mxu1 %v160_v8  ;;  %p387_p5 = pnand %p386_p4, %p380_p1 }
  0x2e   :  { %300 = vmatmul.mubr.msk.f32.vlgmr.msra.gmra.mxu0 %vm75_vm0, %v63_v5  ;;  %307 = vmatpush3.msra.mxu1 %v160_v8 }
  0x2f   :  { %308 = vmatprep.subr.mxu1 %v159_v9 }
  0x30   :  { %309 = vmatpush3.msra.mxu1 %v159_v9 }
  0xee   :  { %v301_v11 = vpop.f32.mrf.mxu0 }
  0xef   :  { %v154_v12 = vadd.f32 %v301_v11, %v273_v10 }
  0xf0   :  { %v148_v13 = vpop.f32.mrf.mxu0 }
  0xf1   :  { %v149_v14 = vadd.f32 %v273_v10, %v148_v13  ;;  %v158_v16 = vmax.f32 %v154_v12, 0.0 }
  0xf3   :  { %v157_v15 = vmax.f32 %v149_v14, 0.0 }
  0xf5   :  { %310 = vmatprep.mubr.msk.f32.mxu1 %vm75_vm0, %v157_v15 }
  0xf6   :  { %311 = vmatmul.mubr.msk.f32.vlgmr.msra.gmra.mxu1 %vm75_vm0, %v158_v16 }
 0x1b6   :  { %v312_v18 = vpop.f32.mrf.mxu1 }
 0x1b7   :  { %v248_v19 = vadd.f32 %v312_v18, %v276_v17 }
 0x1b8   :  { %v242_v20 = vpop.f32.mrf.mxu1 }
 0x1b9   :  { %v252_v21 = vadd.f32 %v248_v19, %v63_v5  ;;  %v243_v22 = vadd.f32 %v276_v17, %v242_v20 }
 0x1bb   :  { %254 = vst.msk [vmem:[#allocation8 + $0x8] sm:$0xff] %vm75_vm0, %v252_v21  ;;  %v251_v23 = vadd.f32 %v243_v22, %v62_v2 }
 0x1bd   :  { %253 = vst.msk [vmem:[#allocation8] sm:$0xff] %vm75_vm0, %v251_v23 }
 0x1be   :  { %390 = shalt.err (!%p387_p5)
}
 0x1bf   :  { %266 = dma.vmem_to_hbm [thread:$0]  %s261_s12, 256, %s482_s5, [#allocation4], %s407_s23, %s407_s23, %s408_s24  }
 0x1c0   :  { %403 = dma.done.wait [#allocation4], 256  }
 0x1c1   :  { %404 = vsyncadd [#allocation4], 4294967040 }
 0x1c2   :  { %270 = vsyncpa [#allocation3], 1 }
 0x1c3   :  { %271 = vsyncpa [#allocation6], 1 }
 0x1c4   :  { %272 = vsyncpa [#allocation4], 1 }

</bundles_post_ra>
